<compile_context>
chip_gen: v6e
topology: v6e:2x2x1
jax: 0.10.0
libtpu: 0.0.40
codegen_flags: <defaults>
</compile_context>

<pallas_src>
import functools

import jax
import jax.numpy as jnp
from jax import lax
from jax.experimental import pallas as pl
from jax.experimental.pallas import tpu as pltpu

LANE = 128   # TPU lane width; spatial axis stays lane-dense
RC = 32      # rows per in-kernel compute chunk (multiple of 8 sublanes)


def _f1_kernel(p_ref, x_ref, *out_refs, rc):
    # p_ref : (24,) f32 SMEM = [w1[oc,ic] (9), b1 (3), w2[oc,ic] (9), b2 (3)]
    # x_ref / out_refs : (1, 3, TR, 128) VMEM blocks (NCHW-native view).
    o2_ref = out_refs[-1]
    o1_ref = out_refs[0] if len(out_refs) == 2 else None

    p = [p_ref[i] for i in range(24)]          # hoist SMEM scalar reads
    tr = x_ref.shape[2]
    n_chunks = tr // rc                        # wrapper guarantees rc | tr

    def chunk(rows):
        x0 = x_ref[0, 0, rows, :]
        x1 = x_ref[0, 1, rows, :]
        x2 = x_ref[0, 2, rows, :]
        h = []
        for oc in range(3):                    # conv1 + relu1 (VPU broadcast FMA)
            w = 3 * oc
            a = p[w] * x0 + p[w + 1] * x1 + p[w + 2] * x2 + p[9 + oc]
            a = jnp.maximum(a, 0.0)
            if o1_ref is not None:
                o1_ref[0, oc, rows, :] = a
            h.append(a)
        for oc in range(3):                    # conv2 + relu2
            w = 12 + 3 * oc
            a = p[w] * h[0] + p[w + 1] * h[1] + p[w + 2] * h[2] + p[21 + oc]
            o2_ref[0, oc, rows, :] = jnp.maximum(a, 0.0)

    if n_chunks == 1:
        chunk(pl.ds(0, rc))                    # static slice, any rc
    else:
        # rc == RC (multiple of 8) on this path -> aligned dynamic sublane slices.
        def body(i, carry):
            chunk(pl.ds(pl.multiple_of(i * rc, rc), rc))
            return carry
        lax.fori_loop(0, n_chunks, body, 0)


def f1_forward(x, w1, b1, w2, b2, *, max_tr=512, emit_out1=True):
    """x: (N, 3, H, W) f32 NCHW.  w1, w2: (3, 3, 1, 1); b1, b2: (3,).
    Returns (relu(conv1(x)), relu(conv2(relu(conv1(x))))), or only the second
    output if emit_out1=False (saves ~1/3 of the HBM writeback)."""
    N, C, H, W = x.shape
    assert C == 3
    S = H * W

    padded = (S % LANE) != 0
    if padded:
        # Rare case (H*W not a multiple of 128): costs one extra HBM pass.
        # TODO(synk): a flat (N, C, S)-block formulation would avoid this copy.
        x3 = jnp.pad(x.reshape(N, C, S), ((0, 0), (0, 0), (0, LANE - S % LANE)))
    else:
        x3 = x.reshape(N, C, S)                # free contiguous view
    Sp = x3.shape[-1]
    R = Sp // LANE
    x4 = x3.reshape(N, C, R, LANE)             # free reshape

    # Tile selection: lane/sublane-dense blocks, capped so double-buffered VMEM
    # stays small and there are several grid steps per sample (pipelining for
    # N=1, and enough steps for multi-TensorCore chips).  No pad of R to a
    # multiple of TR: Pallas masks the ragged last block.
    if R <= RC:
        TR = R                                 # equals full dim -> always legal
        rc = R
    else:
        blocks_wanted = max(1, 8 // N)
        TR = max(RC, min(max_tr, pl.cdiv(R, blocks_wanted)))
        TR = (TR // RC) * RC                   # multiple of RC (and of 8)
        rc = RC
    n_blocks = pl.cdiv(R, TR)

    # Pack conv params into one small SMEM array (scalar broadcast source).
    params = jnp.concatenate([
        w1[:, :, 0, 0].reshape(-1), b1.reshape(-1),
        w2[:, :, 0, 0].reshape(-1), b2.reshape(-1),
    ]).astype(jnp.float32)

    blk = (1, C, TR, LANE)
    idx = lambda n, r: (n, 0, r, 0)

    out_shapes, out_specs = [], []
    if emit_out1:
        out_shapes.append(jax.ShapeDtypeStruct((N, C, R, LANE), jnp.float32))
        out_specs.append(pl.BlockSpec(blk, idx))
    out_shapes.append(jax.ShapeDtypeStruct((N, C, R, LANE), jnp.float32))
    out_specs.append(pl.BlockSpec(blk, idx))

    outs = pl.pallas_call(
        functools.partial(_f1_kernel, rc=rc),
        out_shape=tuple(out_shapes),
        grid=(N, n_blocks),
        in_specs=[
            pl.BlockSpec(memory_space=pltpu.MemorySpace.SMEM),   # params (24,)
            pl.BlockSpec(blk, idx),                              # x tile
        ],
        out_specs=tuple(out_specs),
        # Both axes are fully independent; "parallel" lets multi-core chips
        # shard the grid across TensorCores.  Default VMEM limit is ample.
        compiler_params=pltpu.CompilerParams(
            dimension_semantics=("parallel", "parallel")),
    )(params, x4)

    def back(o):
        o = o.reshape(N, C, Sp)
        if padded:
            o = o[:, :, :S]
        return o.reshape(N, C, H, W)

    if emit_out1:
        return back(outs[0]), back(outs[1])
    return back(outs[0])


def _ref_fwd(x, w1, b1, w2, b2):
    y1 = jnp.einsum('oi,nihw->nohw', w1[:, :, 0, 0], x) + b1[None, :, None, None]
    y1 = jnp.maximum(y1, 0.0)
    y2 = jnp.einsum('oi,nihw->nohw', w2[:, :, 0, 0], y1) + b2[None, :, None, None]
    return y1, jnp.maximum(y2, 0.0)


if __name__ == "__main__":
    key = jax.random.PRNGKey(0)
    N, C, H, W = 2, 3, 16, 16
    kx, kw1, kb1, kw2, kb2 = jax.random.split(key, 5)
    x = jax.random.normal(kx, (N, C, H, W), dtype=jnp.float32)

    # Module's deterministic init: conv weights = 1, biases = 0.
    w1 = jnp.ones((3, 3, 1, 1), jnp.float32)
    b1 = jnp.zeros((3,), jnp.float32)
    w2 = jnp.ones((3, 3, 1, 1), jnp.float32)
    b2 = jnp.zeros((3,), jnp.float32)

    out1, out2 = f1_forward(x, w1, b1, w2, b2)
    jax.block_until_ready((out1, out2))
    r1, r2 = _ref_fwd(x, w1, b1, w2, b2)
    assert jnp.allclose(out1, r1, atol=1e-4), "out1 mismatch (const weights)"
    assert jnp.allclose(out2, r2, atol=1e-4), "out2 mismatch (const weights)"

    # Random weights validate the channel-mix indexing.
    w1r = jax.random.normal(kw1, (3, 3, 1, 1), jnp.float32)
    b1r = jax.random.normal(kb1, (3,), jnp.float32)
    w2r = jax.random.normal(kw2, (3, 3, 1, 1), jnp.float32)
    b2r = jax.random.normal(kb2, (3,), jnp.float32)
    o1r, o2r = f1_forward(x, w1r, b1r, w2r, b2r)
    jax.block_until_ready((o1r, o2r))
    rr1, rr2 = _ref_fwd(x, w1r, b1r, w2r, b2r)
    assert jnp.allclose(o1r, rr1, atol=1e-4), "out1 mismatch (random weights)"
    assert jnp.allclose(o2r, rr2, atol=1e-4), "out2 mismatch (random weights)"

    # out1-skipping variant (when out1 is not consumed): less HBM writeback.
    o2_only = f1_forward(x, w1r, b1r, w2r, b2r, emit_out1=False)
    jax.block_until_ready(o2_only)
    assert jnp.allclose(o2_only, rr2, atol=1e-4), "out2-only mismatch"

    # Multi-block / in-kernel chunk-loop path (N=1, several grid steps).
    xb = jax.random.normal(kx, (1, 3, 256, 256), dtype=jnp.float32)
    ob1, ob2 = f1_forward(xb, w1r, b1r, w2r, b2r)
    jax.block_until_ready((ob1, ob2))
    rb1, rb2 = _ref_fwd(xb, w1r, b1r, w2r, b2r)
    assert jnp.allclose(ob1, rb1, atol=1e-4), "out1 mismatch (multi-block)"
    assert jnp.allclose(ob2, rb2, atol=1e-4), "out2 mismatch (multi-block)"

    # Ragged spatial size (H*W not a multiple of 128, R not a multiple of TR).
    xr = jax.random.normal(kx, (1, 3, 100, 100), dtype=jnp.float32)
    or1, or2 = f1_forward(xr, w1r, b1r, w2r, b2r)
    jax.block_until_ready((or1, or2))
    rra, rrb = _ref_fwd(xr, w1r, b1r, w2r, b2r)
    assert jnp.allclose(or1, rra, atol=1e-4), "out1 mismatch (ragged)"
    assert jnp.allclose(or2, rrb, atol=1e-4), "out2 mismatch (ragged)"

    # Mimic the torch module's forward-side prints (channel 0 of each output).
    print('------- one conv one relu --------')
    print(out1[:, 0, :, :])
    print(out2[:, 0, :, :])
    print("KERNEL_OK")
</pallas_src>

<mosaic_0001>
module attributes {stable_mosaic.version = 11 : i64} {
  func.func @_f1_kernel(%arg0: i32, %arg1: i32, %arg2: memref<24xf32, #tpu.memory_space<smem>>, %arg3: memref<1x3x2x128xf32, #tpu.memory_space<vmem>>, %arg4: memref<1x3x2x128xf32, #tpu.memory_space<vmem>>, %arg5: memref<1x3x2x128xf32, #tpu.memory_space<vmem>>) attributes {dimension_semantics = [#tpu.dimension_semantics<parallel>, #tpu.dimension_semantics<parallel>], iteration_bounds = array<i64: 2, 1>, scalar_prefetch = 0 : i64, scratch_operands = 0 : i64, tpu.core_type = #tpu.core_type<tc>, window_params = [{transform_indices = @transform_0, window_bounds = array<i64: 24>}, {transform_indices = @transform_1, window_bounds = array<i64: 1, 3, 2, 128>}, {transform_indices = @transform_2, window_bounds = array<i64: 1, 3, 2, 128>}, {transform_indices = @transform_3, window_bounds = array<i64: 1, 3, 2, 128>}]} {
    %c0 = arith.constant 0 : index
    %0 = memref.load %arg2[%c0] : memref<24xf32, #tpu.memory_space<smem>>
    %c1 = arith.constant 1 : index
    %1 = memref.load %arg2[%c1] : memref<24xf32, #tpu.memory_space<smem>>
    %c2 = arith.constant 2 : index
    %2 = memref.load %arg2[%c2] : memref<24xf32, #tpu.memory_space<smem>>
    %c3 = arith.constant 3 : index
    %3 = memref.load %arg2[%c3] : memref<24xf32, #tpu.memory_space<smem>>
    %c4 = arith.constant 4 : index
    %4 = memref.load %arg2[%c4] : memref<24xf32, #tpu.memory_space<smem>>
    %c5 = arith.constant 5 : index
    %5 = memref.load %arg2[%c5] : memref<24xf32, #tpu.memory_space<smem>>
    %c6 = arith.constant 6 : index
    %6 = memref.load %arg2[%c6] : memref<24xf32, #tpu.memory_space<smem>>
    %c7 = arith.constant 7 : index
    %7 = memref.load %arg2[%c7] : memref<24xf32, #tpu.memory_space<smem>>
    %c8 = arith.constant 8 : index
    %8 = memref.load %arg2[%c8] : memref<24xf32, #tpu.memory_space<smem>>
    %c9 = arith.constant 9 : index
    %9 = memref.load %arg2[%c9] : memref<24xf32, #tpu.memory_space<smem>>
    %c10 = arith.constant 10 : index
    %10 = memref.load %arg2[%c10] : memref<24xf32, #tpu.memory_space<smem>>
    %c11 = arith.constant 11 : index
    %11 = memref.load %arg2[%c11] : memref<24xf32, #tpu.memory_space<smem>>
    %c12 = arith.constant 12 : index
    %12 = memref.load %arg2[%c12] : memref<24xf32, #tpu.memory_space<smem>>
    %c13 = arith.constant 13 : index
    %13 = memref.load %arg2[%c13] : memref<24xf32, #tpu.memory_space<smem>>
    %c14 = arith.constant 14 : index
    %14 = memref.load %arg2[%c14] : memref<24xf32, #tpu.memory_space<smem>>
    %c15 = arith.constant 15 : index
    %15 = memref.load %arg2[%c15] : memref<24xf32, #tpu.memory_space<smem>>
    %c16 = arith.constant 16 : index
    %16 = memref.load %arg2[%c16] : memref<24xf32, #tpu.memory_space<smem>>
    %c17 = arith.constant 17 : index
    %17 = memref.load %arg2[%c17] : memref<24xf32, #tpu.memory_space<smem>>
    %c18 = arith.constant 18 : index
    %18 = memref.load %arg2[%c18] : memref<24xf32, #tpu.memory_space<smem>>
    %c19 = arith.constant 19 : index
    %19 = memref.load %arg2[%c19] : memref<24xf32, #tpu.memory_space<smem>>
    %c20 = arith.constant 20 : index
    %20 = memref.load %arg2[%c20] : memref<24xf32, #tpu.memory_space<smem>>
    %c21 = arith.constant 21 : index
    %21 = memref.load %arg2[%c21] : memref<24xf32, #tpu.memory_space<smem>>
    %c22 = arith.constant 22 : index
    %22 = memref.load %arg2[%c22] : memref<24xf32, #tpu.memory_space<smem>>
    %c23 = arith.constant 23 : index
    %23 = memref.load %arg2[%c23] : memref<24xf32, #tpu.memory_space<smem>>
    %c0_0 = arith.constant 0 : index
    %c0_1 = arith.constant 0 : index
    %c0_2 = arith.constant 0 : index
    %c0_3 = arith.constant 0 : index
    %24 = vector.load %arg3[%c0_0, %c0_1, %c0_2, %c0_3] : memref<1x3x2x128xf32, #tpu.memory_space<vmem>>, vector<1x1x2x128xf32>
    %25 = vector.shape_cast %24 : vector<1x1x2x128xf32> to vector<2x128xf32>
    %c0_4 = arith.constant 0 : index
    %c1_5 = arith.constant 1 : index
    %c0_6 = arith.constant 0 : index
    %c0_7 = arith.constant 0 : index
    %26 = vector.load %arg3[%c0_4, %c1_5, %c0_6, %c0_7] : memref<1x3x2x128xf32, #tpu.memory_space<vmem>>, vector<1x1x2x128xf32>
    %27 = vector.shape_cast %26 : vector<1x1x2x128xf32> to vector<2x128xf32>
    %c0_8 = arith.constant 0 : index
    %c2_9 = arith.constant 2 : index
    %c0_10 = arith.constant 0 : index
    %c0_11 = arith.constant 0 : index
    %28 = vector.load %arg3[%c0_8, %c2_9, %c0_10, %c0_11] : memref<1x3x2x128xf32, #tpu.memory_space<vmem>>, vector<1x1x2x128xf32>
    %29 = vector.shape_cast %28 : vector<1x1x2x128xf32> to vector<2x128xf32>
    %30 = vector.broadcast %0 : f32 to vector<2x128xf32>
    %31 = arith.mulf %30, %25 : vector<2x128xf32>
    %32 = vector.broadcast %1 : f32 to vector<2x128xf32>
    %33 = arith.mulf %32, %27 : vector<2x128xf32>
    %34 = arith.addf %31, %33 : vector<2x128xf32>
    %35 = vector.broadcast %2 : f32 to vector<2x128xf32>
    %36 = arith.mulf %35, %29 : vector<2x128xf32>
    %37 = arith.addf %34, %36 : vector<2x128xf32>
    %38 = vector.broadcast %9 : f32 to vector<2x128xf32>
    %39 = arith.addf %37, %38 : vector<2x128xf32>
    %cst = arith.constant 0.000000e+00 : f32
    %40 = vector.broadcast %cst : f32 to vector<2x128xf32>
    %41 = arith.maximumf %39, %40 : vector<2x128xf32>
    %c0_12 = arith.constant 0 : index
    %c0_13 = arith.constant 0 : index
    %c0_14 = arith.constant 0 : index
    %c0_15 = arith.constant 0 : index
    %42 = vector.load %arg4[%c0_12, %c0_13, %c0_14, %c0_15] : memref<1x3x2x128xf32, #tpu.memory_space<vmem>>, vector<1x1x2x128xf32>
    %43 = vector.shape_cast %42 : vector<1x1x2x128xf32> to vector<2x128xf32>
    %44 = vector.shape_cast %41 : vector<2x128xf32> to vector<1x1x2x128xf32>
    tpu.vector_store %arg4[%c0_12, %c0_13, %c0_14, %c0_15], %44 {strides = array<i32>} : memref<1x3x2x128xf32, #tpu.memory_space<vmem>>, vector<1x1x2x128xf32>,
    %45 = vector.broadcast %3 : f32 to vector<2x128xf32>
    %46 = arith.mulf %45, %25 : vector<2x128xf32>
    %47 = vector.broadcast %4 : f32 to vector<2x128xf32>
    %48 = arith.mulf %47, %27 : vector<2x128xf32>
    %49 = arith.addf %46, %48 : vector<2x128xf32>
    %50 = vector.broadcast %5 : f32 to vector<2x128xf32>
    %51 = arith.mulf %50, %29 : vector<2x128xf32>
    %52 = arith.addf %49, %51 : vector<2x128xf32>
    %53 = vector.broadcast %10 : f32 to vector<2x128xf32>
    %54 = arith.addf %52, %53 : vector<2x128xf32>
    %cst_16 = arith.constant 0.000000e+00 : f32
    %55 = vector.broadcast %cst_16 : f32 to vector<2x128xf32>
    %56 = arith.maximumf %54, %55 : vector<2x128xf32>
    %c0_17 = arith.constant 0 : index
    %c1_18 = arith.constant 1 : index
    %c0_19 = arith.constant 0 : index
    %c0_20 = arith.constant 0 : index
    %57 = vector.load %arg4[%c0_17, %c1_18, %c0_19, %c0_20] : memref<1x3x2x128xf32, #tpu.memory_space<vmem>>, vector<1x1x2x128xf32>
    %58 = vector.shape_cast %57 : vector<1x1x2x128xf32> to vector<2x128xf32>
    %59 = vector.shape_cast %56 : vector<2x128xf32> to vector<1x1x2x128xf32>
    tpu.vector_store %arg4[%c0_17, %c1_18, %c0_19, %c0_20], %59 {strides = array<i32>} : memref<1x3x2x128xf32, #tpu.memory_space<vmem>>, vector<1x1x2x128xf32>,
    %60 = vector.broadcast %6 : f32 to vector<2x128xf32>
    %61 = arith.mulf %60, %25 : vector<2x128xf32>
    %62 = vector.broadcast %7 : f32 to vector<2x128xf32>
    %63 = arith.mulf %62, %27 : vector<2x128xf32>
    %64 = arith.addf %61, %63 : vector<2x128xf32>
    %65 = vector.broadcast %8 : f32 to vector<2x128xf32>
    %66 = arith.mulf %65, %29 : vector<2x128xf32>
    %67 = arith.addf %64, %66 : vector<2x128xf32>
    %68 = vector.broadcast %11 : f32 to vector<2x128xf32>
    %69 = arith.addf %67, %68 : vector<2x128xf32>
    %cst_21 = arith.constant 0.000000e+00 : f32
    %70 = vector.broadcast %cst_21 : f32 to vector<2x128xf32>
    %71 = arith.maximumf %69, %70 : vector<2x128xf32>
    %c0_22 = arith.constant 0 : index
    %c2_23 = arith.constant 2 : index
    %c0_24 = arith.constant 0 : index
    %c0_25 = arith.constant 0 : index
    %72 = vector.load %arg4[%c0_22, %c2_23, %c0_24, %c0_25] : memref<1x3x2x128xf32, #tpu.memory_space<vmem>>, vector<1x1x2x128xf32>
    %73 = vector.shape_cast %72 : vector<1x1x2x128xf32> to vector<2x128xf32>
    %74 = vector.shape_cast %71 : vector<2x128xf32> to vector<1x1x2x128xf32>
    tpu.vector_store %arg4[%c0_22, %c2_23, %c0_24, %c0_25], %74 {strides = array<i32>} : memref<1x3x2x128xf32, #tpu.memory_space<vmem>>, vector<1x1x2x128xf32>,
    %75 = vector.broadcast %12 : f32 to vector<2x128xf32>
    %76 = arith.mulf %75, %41 : vector<2x128xf32>
    %77 = vector.broadcast %13 : f32 to vector<2x128xf32>
    %78 = arith.mulf %77, %56 : vector<2x128xf32>
    %79 = arith.addf %76, %78 : vector<2x128xf32>
    %80 = vector.broadcast %14 : f32 to vector<2x128xf32>
    %81 = arith.mulf %80, %71 : vector<2x128xf32>
    %82 = arith.addf %79, %81 : vector<2x128xf32>
    %83 = vector.broadcast %21 : f32 to vector<2x128xf32>
    %84 = arith.addf %82, %83 : vector<2x128xf32>
    %cst_26 = arith.constant 0.000000e+00 : f32
    %85 = vector.broadcast %cst_26 : f32 to vector<2x128xf32>
    %86 = arith.maximumf %84, %85 : vector<2x128xf32>
    %c0_27 = arith.constant 0 : index
    %c0_28 = arith.constant 0 : index
    %c0_29 = arith.constant 0 : index
    %c0_30 = arith.constant 0 : index
    %87 = vector.load %arg5[%c0_27, %c0_28, %c0_29, %c0_30] : memref<1x3x2x128xf32, #tpu.memory_space<vmem>>, vector<1x1x2x128xf32>
    %88 = vector.shape_cast %87 : vector<1x1x2x128xf32> to vector<2x128xf32>
    %89 = vector.shape_cast %86 : vector<2x128xf32> to vector<1x1x2x128xf32>
    tpu.vector_store %arg5[%c0_27, %c0_28, %c0_29, %c0_30], %89 {strides = array<i32>} : memref<1x3x2x128xf32, #tpu.memory_space<vmem>>, vector<1x1x2x128xf32>,
    %90 = vector.broadcast %15 : f32 to vector<2x128xf32>
    %91 = arith.mulf %90, %41 : vector<2x128xf32>
    %92 = vector.broadcast %16 : f32 to vector<2x128xf32>
    %93 = arith.mulf %92, %56 : vector<2x128xf32>
    %94 = arith.addf %91, %93 : vector<2x128xf32>
    %95 = vector.broadcast %17 : f32 to vector<2x128xf32>
    %96 = arith.mulf %95, %71 : vector<2x128xf32>
    %97 = arith.addf %94, %96 : vector<2x128xf32>
    %98 = vector.broadcast %22 : f32 to vector<2x128xf32>
    %99 = arith.addf %97, %98 : vector<2x128xf32>
    %cst_31 = arith.constant 0.000000e+00 : f32
    %100 = vector.broadcast %cst_31 : f32 to vector<2x128xf32>
    %101 = arith.maximumf %99, %100 : vector<2x128xf32>
    %c0_32 = arith.constant 0 : index
    %c1_33 = arith.constant 1 : index
    %c0_34 = arith.constant 0 : index
    %c0_35 = arith.constant 0 : index
    %102 = vector.load %arg5[%c0_32, %c1_33, %c0_34, %c0_35] : memref<1x3x2x128xf32, #tpu.memory_space<vmem>>, vector<1x1x2x128xf32>
    %103 = vector.shape_cast %102 : vector<1x1x2x128xf32> to vector<2x128xf32>
    %104 = vector.shape_cast %101 : vector<2x128xf32> to vector<1x1x2x128xf32>
    tpu.vector_store %arg5[%c0_32, %c1_33, %c0_34, %c0_35], %104 {strides = array<i32>} : memref<1x3x2x128xf32, #tpu.memory_space<vmem>>, vector<1x1x2x128xf32>,
    %105 = vector.broadcast %18 : f32 to vector<2x128xf32>
    %106 = arith.mulf %105, %41 : vector<2x128xf32>
    %107 = vector.broadcast %19 : f32 to vector<2x128xf32>
    %108 = arith.mulf %107, %56 : vector<2x128xf32>
    %109 = arith.addf %106, %108 : vector<2x128xf32>
    %110 = vector.broadcast %20 : f32 to vector<2x128xf32>
    %111 = arith.mulf %110, %71 : vector<2x128xf32>
    %112 = arith.addf %109, %111 : vector<2x128xf32>
    %113 = vector.broadcast %23 : f32 to vector<2x128xf32>
    %114 = arith.addf %112, %113 : vector<2x128xf32>
    %cst_36 = arith.constant 0.000000e+00 : f32
    %115 = vector.broadcast %cst_36 : f32 to vector<2x128xf32>
    %116 = arith.maximumf %114, %115 : vector<2x128xf32>
    %c0_37 = arith.constant 0 : index
    %c2_38 = arith.constant 2 : index
    %c0_39 = arith.constant 0 : index
    %c0_40 = arith.constant 0 : index
    %117 = vector.load %arg5[%c0_37, %c2_38, %c0_39, %c0_40] : memref<1x3x2x128xf32, #tpu.memory_space<vmem>>, vector<1x1x2x128xf32>
    %118 = vector.shape_cast %117 : vector<1x1x2x128xf32> to vector<2x128xf32>
    %119 = vector.shape_cast %116 : vector<2x128xf32> to vector<1x1x2x128xf32>
    tpu.vector_store %arg5[%c0_37, %c2_38, %c0_39, %c0_40], %119 {strides = array<i32>} : memref<1x3x2x128xf32, #tpu.memory_space<vmem>>, vector<1x1x2x128xf32>,
    return
  }
  func.func @transform_0(%arg0: i32, %arg1: i32) -> i32 {
    %c0_i32 = arith.constant 0 : i32
    %c0_i32_0 = arith.constant 0 : i32
    return %c0_i32 : i32
  }
  func.func @transform_1(%arg0: i32, %arg1: i32) -> (i32, i32, i32, i32) {
    %c0_i32 = arith.constant 0 : i32
    %c0_i32_0 = arith.constant 0 : i32
    %c0_i32_1 = arith.constant 0 : i32
    return %arg0, %c0_i32, %arg1, %c0_i32_0 : i32, i32, i32, i32
  }
  func.func @transform_2(%arg0: i32, %arg1: i32) -> (i32, i32, i32, i32) {
    %c0_i32 = arith.constant 0 : i32
    %c0_i32_0 = arith.constant 0 : i32
    %c0_i32_1 = arith.constant 0 : i32
    return %arg0, %c0_i32, %arg1, %c0_i32_0 : i32, i32, i32, i32
  }
  func.func @transform_3(%arg0: i32, %arg1: i32) -> (i32, i32, i32, i32) {
    %c0_i32 = arith.constant 0 : i32
    %c0_i32_0 = arith.constant 0 : i32
    %c0_i32_1 = arith.constant 0 : i32
    return %arg0, %c0_i32, %arg1, %c0_i32_0 : i32, i32, i32, i32
  }
}

</mosaic_0001>

<bundles_post_ra>
// kernel: tpu_custom_call.1
= control target key start
LH: loop header
LB: loop body
LE: loop exit
PB: predicated region body
PF: predicated region fallthrough
CT: control target
= control target key end

     0   :  { %9 = vsyncpa [#allocation5], 0  ;;  %s1048_s0 = inlined_call_operand.hbm [shape: f32[24], index: 0, kind: input, shape index: {}]   ;;  %s1049_s1 = inlined_call_operand.hbm [shape: f32[2,3,2,128], index: 1, kind: input, shape index: {}]   ;;  %s1050_s2 = inlined_call_operand.hbm [shape: f32[2,3,2,128], index: 2, kind: output, shape index: {0}]   ;;  %s1051_s3 = inlined_call_operand.hbm [shape: f32[2,3,2,128], index: 3, kind: output, shape index: {1}]  }
   0x1   :  { %10 = vsyncpa [#allocation3], 0 }
   0x2   :  { %12 = vsyncpa [#allocation3 + $0x1], 0 }
   0x3   :  { %13 = vsyncpa [#allocation4], 0 }
   0x4   :  { %15 = vsyncpa [#allocation4 + $0x1], 0 }
   0x5   :  { %16 = vsyncpa [#allocation9], 0 }
   0x6   :  { %18 = vsyncpa [#allocation9 + $0x1], 0  ;;  %s815_s12 = smov 0   ;;  %s817_s13 = smov 0  }
   0x7   :  { %s819_s14 = smov 0   ;;  %s821_s15 = smov 0  }
   0x8   :  { %s823_s16 = smov 0   ;;  %s825_s17 = smov 0  }
   0x9 LB: > { %1054 = sst [smem:[#allocation14_spill]] %s785_s17  ;;  %s504_s18 = sadd.s32 4294967295, %s785_s17   ;;  %s785_s17 = sphi %s825_s17, %s24_s17   ;;  %s781_s16 = sphi %s823_s16, %s1068_s16   ;;  %s777_s15 = sphi %s821_s15, %s1067_s15   ;;  %s773_s14 = sphi %s819_s14, %s1066_s14   ;;  %s769_s13 = sphi %s817_s13, %s1065_s13   ;;  %s765_s12 = sphi %s815_s12, %s1064_s12  }
   0xa   : > { %s505_s19 = sadd.s32 4294967294, %s785_s17   ;;  %s66_s20 = sadd.s32 1, %s773_s14 }
   0xb   : > { %p73_p0 = scmp.ne.s32.totalorder %s773_s14, %s769_s13  ;;  %p74_p1 = scmp.eq.s32.totalorder %s785_s17, 0 }
   0xc   : > { %p79_p2 = scmp.ne.s32.totalorder %s769_s13, %s765_s12  ;;  %p853_p3 = scmp.eq.s32.totalorder %s504_s18, 0 }
   0xd   : > { %p105_p4 = scmp.eq.s32.totalorder %s504_s18, 1  ;;  %p75_p5 = por %p74_p1, %p73_p0 }
   0xe   : > { %p111_p6 = scmp.eq.s32.totalorder %s505_s19, 1  ;;  %p859_p7 = por %p853_p3, %p79_p2 }
   0xf   : > { %p863_p8 = por %p105_p4, %p73_p0  ;;  %p506_p10 = scmp.ge.s32.totalorder %s785_s17, 1 }
  0x10   : > { %p867_p9 = por %p111_p6, %p79_p2  ;;  %p146_p11 = scmp.lt.s32.totalorder %s785_s17, 3 }
  0x11   : > { %p576_p1 = scmp.lt.s32.totalorder %s785_s17, 2  ;;  %s168_s26 = sand.u32 1, %s773_s14  }
  0x12   : > { %s1058_s24 = scalar_select %p867_p9, 1, 0 }
  0x13   : > { %p874_p13 = pnand %p506_p10, %p146_p11  ;;  %p882_p2 = pnand %p576_p1, %p75_p5 }
  0x14   : > { %s36_s28 = sadd.s32 1, %s781_s16  ;;  %s545_s29 = smul.u32 6, %s168_s26 }
  0x15   : > { %p560_p0 = pneg %p874_p13  ;;  %p38_p6 = scmp.ge.s32.totalorder %s36_s28, 2 }
  0x16   : > { %s787_s30 = smov [#allocation2]   ;;  %s546_s6 = smul.u32 96, %s781_s16 }
  0x17   : > { %p561_p4 = pnand %p560_p0, %p853_p3  ;;  %s1070_s28 = smov (%p38_p6, %s36_s28), 0 }
  0x18   : > { %s61_s7 = ssub.s32 %s781_s16, %s1070_s28  ;;  %s172_s8 = scalar_lea.vmem [#allocation6], %s545_s29 }
  0x19   : > { %563 = dma.hbm_to_smem (!%p561_p4), %s1048_s0, 16, %s787_s30, [#allocation5]  }
  0x1a   : > { %s180_s9 = sshll.u32 %s172_s8, 4  ;;  %p64_p5 = scmp.eq.s32.totalorder %s61_s7, 0  ;;  %s181_s9 = int_to_ptr.vmem [resolvable:$true] %s180_s9 }
  0x1b   : > { %s179_s18 = scalar_lea.hbm %s1049_s1, %s546_s6  ;;  %s169_s17 = scalar_lea.sflag [#allocation3], %s168_s26 }
  0x1c   : > { %s903_s19 = scalar_select %p64_p5, %s773_s14, %s66_s20  }
  0x1d   : > { %p645_p10 = pneg %p882_p2  ;;  %s656_s30 = scalar_lea.vmem %s181_s9, 96 }
  0x1e   : > { %p657_p11 = scmp.ne.s32.totalorder %s181_s9, %s656_s30  ;;  %s788_s4 = smov [#allocation6]  }
  0x1f   : > { %s661_s5 = sshll.u32 %s788_s4, 4  ;;  %s662_s5 = int_to_ptr.vmem [resolvable:$false] %s661_s5 }
  0x20   : > { %p659_p1 = pnand %p657_p11, %p645_p10  ;;  %s663_s29 = scalar_lea.vmem %s662_s5, 192 }
  0x21   : > { %p664_p4 = scmp.lt.s32.totalorder %s181_s9, %s662_s5  ;;  %p665_p6 = scmp.lt.s32.totalorder %s663_s29, %s656_s30 }
  0x22   : > { %p660_p0 = pneg %p659_p1 }
  0x23   : > { %p666_p12 = por %p665_p6, %p664_p4 }
  0x25   : > { %p667_p9 = pnand %p666_p12, %p660_p0 }
  0x27   : > { %670 = shalt.err (!%p667_p9)
}
  0x28   : > { %s789_s6 = smov 32   ;;  %s790_s20 = smov 2  }
  0x29   : > { %567 = dma.hbm_to_vmem [thread:$0]  (!%p882_p2), %s179_s18, 96, %s181_s9, %s169_s17, %s789_s6, %s789_s6, %s790_s20  }
  0x2a   : > { %192 = sbr.rel (%p874_p13) target bundleno = 124 (0x7c), region = 28 }
  0x2f   : > { %748 = dma.done.wait (%p853_p3), [#allocation5], 16  }
  0x30   : > { %750 = vsyncadd (%p853_p3), [#allocation5], 4294967280  ;;  %s916_s26 = sand.u32 1, %s769_s13  }
  0x31   : > { %s919_s7 = smul.u32 6, %s916_s26  ;;  %s199_s27 = scalar_lea.sflag [#allocation3], %s916_s26 }
  0x33   : > { %s202_s17 = scalar_lea.vmem [#allocation6], %s919_s7 }
  0x34   : > { %752 = dma.done.wait (%p859_p7), %s199_s27, 96  }
  0x35   : > { %754 = vsyncadd (%p859_p7), %s199_s27, 4294967200 }
  0x36   : > { %207 = sfence }
  0x37   : > { %s231_s25 = sld [smem:[#allocation2]]  ;;  %v255_v0 = vld [vmem:[%s202_s17] sm:$0x3]  ;;  %v535_v1 = vld [vmem:[%s202_s17 + $0x2] sm:$0x3] }
  0x38   : > { %s512_s21 = sld [smem:[#allocation2 + $0x1]]  ;;  %v536_v2 = vld [vmem:[%s202_s17 + $0x4] sm:$0x3] }
  0x39   : > { %s513_s8 = sld [smem:[#allocation2 + $0x2]] }
  0x3a   : > { %s520_s9 = sld [smem:[#allocation2 + $0x9]] }
  0x3b   : > { %s514_s10 = sld [smem:[#allocation2 + $0x3]] }
  0x3c   : > { %s515_s11 = sld [smem:[#allocation2 + $0x4]] }
  0x3d   : > { %v260_v3 = vstv %s231_s25  ;;  %s516_s18 = sld [smem:[#allocation2 + $0x5]] }
  0x3e   : > { %v261_v4 = vmul.f32 %v260_v3, %v255_v0  ;;  %v262_v5 = vstv %s512_s21  ;;  %s927_s30 = sld [smem:[#allocation2 + $0xa]] }
  0x3f   : > { %v263_v6 = vmul.f32 %v535_v1, %v262_v5  ;;  %v265_v7 = vstv %s513_s8  ;;  %s517_s22 = sld [smem:[#allocation2 + $0x6]]  ;;  %s939_s8 = scalar_lea.vmem [#allocation7], %s919_s7 }
  0x40   : > { %v266_v8 = vmul.f32 %v536_v2, %v265_v7  ;;  %s518_s4 = sld [smem:[#allocation2 + $0x7]]  ;;  %v268_v11 = vstv %s520_s9 }
  0x41   : > { %v264_v9 = vadd.f32 %v263_v6, %v261_v4  ;;  %v272_v10 = vstv %s514_s10  ;;  %s519_s5 = sld [smem:[#allocation2 + $0x8]] }
  0x42   : > { %v273_v12 = vmul.f32 %v272_v10, %v255_v0  ;;  %v274_v13 = vstv %s515_s11  ;;  %s929_s29 = sld [smem:[#allocation2 + $0xb]] }
  0x43   : > { %v267_v14 = vadd.f32 %v266_v8, %v264_v9  ;;  %v275_v15 = vmul.f32 %v535_v1, %v274_v13  ;;  %v277_v16 = vstv %s516_s18  ;;  %s523_s6 = sld [smem:[#allocation2 + $0xc]] }
  0x44   : > { %v278_v17 = vmul.f32 %v536_v2, %v277_v16  ;;  %s931_s20 = sld [smem:[#allocation2 + $0xd]]  ;;  %v280_v21 = vstv %s927_s30  ;;  %s356_s30 = sshll.u32 %s939_s8, 4  ;;  %s952_s30 = int_to_ptr.vmem [resolvable:$true] %s356_s30 }
  0x45   : > { %v269_v18 = vadd.f32 %v268_v11, %v267_v14  ;;  %v276_v19 = vadd.f32 %v275_v15, %v273_v12  ;;  %v285_v20 = vstv %s517_s22  ;;  %s933_s27 = sld [smem:[#allocation2 + $0xe]] }
  0x46   : > { %v286_v22 = vmul.f32 %v285_v20, %v255_v0  ;;  %v287_v23 = vstv %s518_s4  ;;  %s936_s17 = sld [smem:[#allocation2 + $0x15]] }
  0x47   : > { %v270_v24 = vmax.f32 %v269_v18, 0.0  ;;  %v279_v25 = vadd.f32 %v278_v17, %v276_v19  ;;  %v288_v26 = vmul.f32 %v535_v1, %v287_v23  ;;  %v290_v27 = vstv %s519_s5  ;;  %s526_s25 = sld [smem:[#allocation2 + $0xf]]  ;;  %s548_s5 = smul.u32 96, %s777_s15 }
  0x48   : > { %v291_v28 = vmul.f32 %v536_v2, %v290_v27  ;;  %s527_s21 = sld [smem:[#allocation2 + $0x10]]  ;;  %v293_v32 = vstv %s929_s29 }
  0x49   : > { %271 = vst [vmem:[%s939_s8] sm:$0x3] %v270_v24  ;;  %v281_v29 = vadd.f32 %v280_v21, %v279_v25  ;;  %v289_v30 = vadd.f32 %v288_v26, %v286_v22  ;;  %v298_v31 = vstv %s523_s6  ;;  %s528_s9 = sld [smem:[#allocation2 + $0x11]] }
  0x4a   : > { %v300_v33 = vstv %s931_s20  ;;  %s944_s10 = sld [smem:[#allocation2 + $0x16]]  ;;  %v299_v36 = vmul.f32 %v298_v31, %v270_v24  ;;  %s962_s20 = scalar_lea.hbm %s1050_s2, %s548_s5 }
  0x4b   : > { %v282_v34 = vmax.f32 %v281_v29, 0.0  ;;  %v292_v35 = vadd.f32 %v291_v28, %v289_v30  ;;  %s529_s11 = sld [smem:[#allocation2 + $0x12]]  ;;  %v303_v40 = vstv %s933_s27  ;;  %s337_s27 = scalar_lea.sflag [#allocation4], %s916_s26 }
  0x4c   : > { %s530_s18 = sld [smem:[#allocation2 + $0x13]]  ;;  %v306_v51 = vstv %s936_s17  ;;  %s671_s17 = scalar_lea.vmem %s952_s30, 96 }
  0x4d   : > { %537 = vst [vmem:[%s939_s8 + $0x2] sm:$0x3] %v282_v34  ;;  %v294_v37 = vadd.f32 %v293_v32, %v292_v35  ;;  %v301_v38 = vmul.f32 %v300_v33, %v282_v34  ;;  %v310_v39 = vstv %s526_s25  ;;  %s531_s22 = sld [smem:[#allocation2 + $0x14]]  ;;  %p672_p3 = scmp.ne.s32.totalorder %s952_s30, %s671_s17 }
  0x4e   : > { %v311_v41 = vmul.f32 %v310_v39, %v270_v24  ;;  %v312_v42 = vstv %s527_s21  ;;  %s949_s4 = sld [smem:[#allocation2 + $0x17]]  ;;  %s791_s25 = smov [#allocation7]  }
  0x4f   : > { %v295_v43 = vmax.f32 %v294_v37, 0.0  ;;  %v302_v44 = vadd.f32 %v301_v38, %v299_v36  ;;  %v313_v45 = vmul.f32 %v312_v42, %v282_v34  ;;  %v315_v46 = vstv %s528_s9  ;;  %p673_p7 = pnand %p672_p3, %p863_p8  ;;  %s675_s21 = sshll.u32 %s791_s25, 4  ;;  %s676_s21 = int_to_ptr.vmem [resolvable:$false] %s675_s21 }
  0x50   : > { %v318_v52 = vstv %s944_s10  ;;  %p678_p12 = scmp.lt.s32.totalorder %s952_s30, %s676_s21 }
  0x51   : > { %538 = vst [vmem:[%s939_s8 + $0x4] sm:$0x3] %v295_v43  ;;  %v304_v47 = vmul.f32 %v303_v40, %v295_v43  ;;  %v314_v48 = vadd.f32 %v313_v45, %v311_v41  ;;  %v316_v49 = vmul.f32 %v315_v46, %v295_v43  ;;  %v323_v50 = vstv %s529_s11  ;;  %p674_p9 = pneg %p673_p7  ;;  %s677_s8 = scalar_lea.vmem %s676_s21, 192 }
  0x52   : > { %v324_v53 = vmul.f32 %v323_v50, %v270_v24  ;;  %v325_v54 = vstv %s530_s18  ;;  %p679_p13 = scmp.lt.s32.totalorder %s677_s8, %s671_s17 }
  0x53   : > { %v305_v55 = vadd.f32 %v304_v47, %v302_v44  ;;  %v317_v56 = vadd.f32 %v316_v49, %v314_v48  ;;  %v326_v57 = vmul.f32 %v325_v54, %v282_v34  ;;  %v328_v58 = vstv %s531_s22 }
  0x54   : > { %v329_v59 = vmul.f32 %v328_v58, %v295_v43  ;;  %p680_p2 = por %p679_p13, %p678_p12 }
  0x55   : > { %v307_v60 = vadd.f32 %v306_v51, %v305_v55  ;;  %v319_v61 = vadd.f32 %v318_v52, %v317_v56  ;;  %v327_v62 = vadd.f32 %v326_v57, %v324_v53 }
  0x56   : > { %p681_p5 = pnand %p680_p2, %p674_p9 }
  0x58   : > { %684 = shalt.err (!%p681_p5)
}
  0x59   : > { %s685_s9 = scalar_lea.hbm %s962_s20, 96  ;;  %s689_s18 = scalar_lea.hbm %s1050_s2, 192 }
  0x5a   : > { %p686_p10 = scmp.ne.s32.totalorder %s962_s20, %s685_s9  ;;  %p690_p0 = scmp.lt.s32.totalorder %s962_s20, %s1050_s2 }
  0x5b   : > { %p691_p4 = scmp.lt.s32.totalorder %s689_s18, %s685_s9 }
  0x5c   : > { %p687_p11 = pnand %p686_p10, %p863_p8 }
  0x5d   : > { %p692_p6 = por %p691_p4, %p690_p0 }
  0x5e   : > { %p688_p1 = pneg %p687_p11 }
  0x60   : > { %p693_p3 = pnand %p692_p6, %p688_p1 }
  0x62   : > { %696 = shalt.err (!%p693_p3)
}
  0x63   : > { %s792_s6 = smov 32   ;;  %s793_s17 = smov 2   ;;  %v331_v63 = vstv %s949_s4  ;;  %v308_v0 = vmax.f32 %v307_v60, 0.0  ;;  %v320_v1 = vmax.f32 %v319_v61, 0.0  ;;  %v330_v2 = vadd.f32 %v329_v59, %v327_v62 }
  0x64   : > { %556 = dma.vmem_to_hbm [thread:$0]  (%p863_p8), %s952_s30, 96, %s962_s20, %s337_s27, %s792_s6, %s792_s6, %s793_s17  }
  0x65   : > { %s230_s25 = scalar_lea.vmem [#allocation8], %s919_s7  ;;  %v332_v3 = vadd.f32 %v331_v63, %v330_v2  ;;  %s999_s30 = scalar_lea.hbm %s1051_s3, %s548_s5 }
  0x66   : > { %s373_s21 = sshll.u32 %s230_s25, 4  ;;  %309 = vst [vmem:[%s230_s25] sm:$0x3] %v308_v0  ;;  %539 = vst [vmem:[%s230_s25 + $0x2] sm:$0x3] %v320_v1  ;;  %s342_s7 = scalar_lea.sflag [#allocation9], %s916_s26  ;;  %s992_s21 = int_to_ptr.vmem [resolvable:$true] %s373_s21 }
  0x67   : > { %v333_v4 = vmax.f32 %v332_v3, 0.0  ;;  %s697_s4 = scalar_lea.vmem %s992_s21, 96  ;;  %s794_s20 = smov [#allocation8]  }
  0x68   : > { %p698_p7 = scmp.ne.s32.totalorder %s992_s21, %s697_s4  ;;  %s701_s27 = sshll.u32 %s794_s20, 4  ;;  %s702_s27 = int_to_ptr.vmem [resolvable:$false] %s701_s27 }
  0x69   : > { %540 = vst [vmem:[%s230_s25 + $0x4] sm:$0x3] %v333_v4  ;;  %s703_s10 = scalar_lea.vmem %s702_s27, 192  ;;  %p704_p13 = scmp.lt.s32.totalorder %s992_s21, %s702_s27 }
  0x6a   : > { %p699_p9 = pnand %p698_p7, %p863_p8  ;;  %p705_p2 = scmp.lt.s32.totalorder %s703_s10, %s697_s4 }
  0x6c   : > { %p700_p12 = pneg %p699_p9  ;;  %p706_p5 = por %p705_p2, %p704_p13 }
  0x6e   : > { %p707_p10 = pnand %p706_p5, %p700_p12 }
  0x70   : > { %710 = shalt.err (!%p707_p10)
}
  0x71   : > { %s711_s15 = scalar_lea.hbm %s999_s30, 96  ;;  %s715_s11 = scalar_lea.hbm %s1051_s3, 192 }
  0x72   : > { %p712_p11 = scmp.ne.s32.totalorder %s999_s30, %s711_s15  ;;  %p716_p4 = scmp.lt.s32.totalorder %s999_s30, %s1051_s3 }
  0x73   : > { %p717_p6 = scmp.lt.s32.totalorder %s715_s11, %s711_s15 }
  0x74   : > { %p713_p1 = pnand %p712_p11, %p863_p8 }
  0x75   : > { %p718_p3 = por %p717_p6, %p716_p4 }
  0x76   : > { %p714_p0 = pneg %p713_p1 }
  0x78   : > { %p719_p7 = pnand %p718_p3, %p714_p0 }
  0x7a   : > { %722 = shalt.err (!%p719_p7)
}
  0x7b   : > { %557 = dma.vmem_to_hbm [thread:$0]  (%p863_p8), %s992_s21, 96, %s999_s30, %s342_s7, %s792_s6, %s792_s6, %s793_s17  }
  0x7c PF: > { %s1061_s29 = sld [smem:[#allocation14_spill]]  ;;  %s388_s25 = sand.u32 1, %s765_s12  }
  0x7d   : > { %p1062_p9 = scmp.ne.s32.totalorder %s1058_s24, 0  ;;  %s389_s8 = scalar_lea.sflag [#allocation4], %s388_s25 }
  0x82   : > { %p1063_p12 = scmp.ge.s32.totalorder %s1061_s29, 2 }
  0x84   : > { %p569_p13 = pnand %p1063_p12, %p1062_p9 }
  0x86   : > { %p570_p2 = pneg %p569_p13 }
  0x88   : > { %756 = dma.done.wait (%p570_p2), %s389_s8, 96  }
  0x89   : > { %758 = vsyncadd (%p570_p2), %s389_s8, 4294967200  ;;  %s398_s9 = scalar_lea.sflag [#allocation9], %s388_s25 }
  0x8a   : > { %760 = dma.done.wait (%p570_p2), %s398_s9, 96  }
  0x8b   : > { %762 = vsyncadd (%p570_p2), %s398_s9, 4294967200  ;;  %s24_s17 = sadd.s32 1, %s1061_s29   ;;  %s1064_s12 = smov %s769_s13 }
  0x8c   : > { %p21_p5 = scmp.ge.s32.totalorder %s24_s17, 4   ;;  %s1065_s13 = smov %s773_s14 }
  0x8d   : > { %s1066_s14 = smov %s903_s19  ;;  %s1067_s15 = smov %s781_s16 }
  0x8e   : > { %s1068_s16 = smov %s1070_s28  ;;  %23 = sbr.rel (!%p21_p5) target bundleno = 9 (0x9), region = 101 }
  0x93   :  { %403 = vsyncpa [#allocation3], 1 }
  0x94   :  { %405 = vsyncpa [#allocation3 + $0x1], 1 }
  0x95   :  { %406 = vsyncpa [#allocation4], 1 }
  0x96   :  { %408 = vsyncpa [#allocation4 + $0x1], 1 }
  0x97   :  { %409 = vsyncpa [#allocation9], 1 }
  0x98   :  { %411 = vsyncpa [#allocation9 + $0x1], 1 }
  0x99   :  { %412 = vsyncpa [#allocation5], 1 }
  0x9a   :  { %414 = vsyncpa [#allocation5 + $0x1], 1 }

</bundles_post_ra>
